<compile_context>
chip_gen: v5e
topology: v5e:2x2
jax: 0.10.0
libtpu: 0.0.40
codegen_flags: <defaults>
</compile_context>

<pallas_src>
import functools

import numpy as np
import jax
import jax.numpy as jnp
from jax.experimental import pallas as pl
from jax.experimental.pallas import tpu as pltpu


def _inverse_softplus(x):
    return np.log(np.expm1(x))


def _softplus(x):
    return np.log1p(np.exp(x))


def _round_up(a, b):
    return ((a + b - 1) // b) * b


# ---------------------------------------------------------------------------
# Kernel 1: per-point MLP  f(x) = fc(rescale(x)) + rescale(x)   (column layout)
# ---------------------------------------------------------------------------
def _mlp_kernel(x_ref, w1_ref, b1_ref, w2_ref, b2_ref, w3_ref, sc_ref, f_ref,
                *, bf16_matmul):
    inv_scale = sc_ref[0]        # 1 / scale
    neg_off = sc_ref[1]          # -offset / scale
    b3 = sc_ref[2]

    x = x_ref[...] * inv_scale + neg_off                               # (TB, 1)
    h = jnp.tanh(x * w1_ref[...] + b1_ref[...])                        # (TB, H)
    w2 = w2_ref[...]
    if bf16_matmul:
        # Native MXU path (bf16 x bf16 -> f32 accumulate).
        h = h.astype(jnp.bfloat16)
        w2 = w2.astype(jnp.bfloat16)
    h = jnp.tanh(jnp.dot(h, w2, preferred_element_type=jnp.float32)
                 + b2_ref[...])
    f_ref[...] = jnp.sum(h * w3_ref[...], axis=-1, keepdims=True) + b3 + x


def _mlp_forward(x_col, w1, b1, w2, b2, w3, scalars, *, block, bf16_matmul):
    npts = x_col.shape[0]
    hpad = w1.shape[1]
    return pl.pallas_call(
        functools.partial(_mlp_kernel, bf16_matmul=bf16_matmul),
        out_shape=jax.ShapeDtypeStruct((npts, 1), jnp.float32),
        grid=(pl.cdiv(npts, block),),
        in_specs=[
            pl.BlockSpec((block, 1), lambda i: (i, 0)),
            pl.BlockSpec((1, hpad), lambda i: (0, 0)),
            pl.BlockSpec((1, hpad), lambda i: (0, 0)),
            pl.BlockSpec((hpad, hpad), lambda i: (0, 0)),
            pl.BlockSpec((1, hpad), lambda i: (0, 0)),
            pl.BlockSpec((1, hpad), lambda i: (0, 0)),
            pl.BlockSpec(memory_space=pltpu.MemorySpace.SMEM),
        ],
        out_specs=pl.BlockSpec((block, 1), lambda i: (i, 0)),
        compiler_params=pltpu.CompilerParams(
            dimension_semantics=("parallel",)),
    )(x_col, w1, b1, w2, b2, w3, scalars)


# ---------------------------------------------------------------------------
# Kernel 2: Gram matrix  K[i, j] = exp((f1_i - f2_j)^2 * neg_inv_lens) * sigma
# ---------------------------------------------------------------------------
def _gram_kernel(f1_ref, f2_ref, sc_ref, out_ref, *, f2_resident):
    neg_inv_lens = sc_ref[0]
    sigma = sc_ref[1]
    if f2_resident:
        # f2 row lives in VMEM for the whole grid; slice the current tile.
        tn = out_ref.shape[1]
        col0 = pl.multiple_of(pl.program_id(1) * tn, 128)
        f2 = f2_ref[:, pl.ds(col0, tn)]                           # (1, TN)
    else:
        f2 = f2_ref[...]                                          # (1, TN)
    d = f1_ref[...] - f2                        # (TM,1) - (1,TN) -> (TM,TN)
    out_ref[...] = (jnp.exp(d * d * neg_inv_lens) * sigma).astype(out_ref.dtype)


def deep_kernel(x1, x2, p, *, tm=512, tn=2048, out_dtype=jnp.float32,
                mlp_bf16_matmul=False):
    """x1: (n,), x2: (m,) -> (n, m) kernel matrix (dtype = out_dtype)."""
    n = int(x1.shape[0])
    m = int(x2.shape[0])

    # ---- Gram tile selection (lane-dense, (8,128)-divisible blocks) ----
    tm = min(tm, _round_up(n, 8))
    tn = min(tn, _round_up(m, 128))
    # Megacore: make sure the parallel (i, j) grid has >= 2 blocks along at
    # least one axis when the problem is large enough to split.
    if pl.cdiv(n, tm) * pl.cdiv(m, tn) < 2:
        m128 = _round_up(m, 128)
        n8 = _round_up(n, 8)
        if m128 >= 256:
            tn = _round_up(m128 // 2, 128)
        elif n8 >= 16:
            tm = _round_up(n8 // 2, 8)

    gi = pl.cdiv(n, tm)
    gj = pl.cdiv(m, tn)
    n_grid = gi * tm          # tiny 1-D padding only (inputs, not the output)
    m_grid = gj * tn

    x1_col = jnp.pad(x1.astype(jnp.float32), (0, n_grid - n)).reshape(n_grid, 1)
    x2_col = jnp.pad(x2.astype(jnp.float32), (0, m_grid - m)).reshape(m_grid, 1)

    # ---- zero-pad hidden width to a multiple of 128 (padded channels are
    #      exactly zero through tanh, so the result is unchanged) ----
    h = p["w1"].shape[1]
    hpad = _round_up(h, 128)
    dh = hpad - h
    w1 = jnp.pad(p["w1"].astype(jnp.float32), ((0, 0), (0, dh)))
    b1 = jnp.pad(p["b1"].astype(jnp.float32), ((0, 0), (0, dh)))
    w2 = jnp.pad(p["w2"].astype(jnp.float32), ((0, dh), (0, dh)))
    b2 = jnp.pad(p["b2"].astype(jnp.float32), ((0, 0), (0, dh)))
    w3 = jnp.pad(p["w3"].astype(jnp.float32), ((0, 0), (0, dh)))

    inv_scale = 1.0 / float(p["scale"])
    mlp_scalars = jnp.array(
        [inv_scale, -float(p["offset"]) * inv_scale, float(p["b3"])],
        dtype=jnp.float32)
    gram_scalars = jnp.array(
        [-1.0 / float(p["lens"]), float(p["sigma"])], dtype=jnp.float32)

    # ---- pass 1: per-point MLP (hoisted out of the (n, m) loop) ----
    f1_col = _mlp_forward(x1_col, w1, b1, w2, b2, w3, mlp_scalars,
                          block=min(512, n_grid), bf16_matmul=mlp_bf16_matmul)
    f2_col = _mlp_forward(x2_col, w1, b1, w2, b2, w3, mlp_scalars,
                          block=min(512, m_grid), bf16_matmul=mlp_bf16_matmul)
    f2_row = f2_col.reshape(1, m_grid)   # size-1 dim -> reshape == transpose
    # NOTE: mean-centering is dropped in-kernel: (f1-mean)-(f2-mean) == f1-f2.

    # Keep the whole f2 row resident in VMEM unless it is large.
    f2_resident = (m_grid * 4) <= (2 << 20)
    if f2_resident:
        f2_spec = pl.BlockSpec((1, m_grid), lambda i, j: (0, 0))
    else:
        f2_spec = pl.BlockSpec((1, tn), lambda i, j: (0, j))

    out_bytes = jnp.dtype(out_dtype).itemsize
    cost = pl.CostEstimate(
        flops=3 * n * m,
        transcendentals=n * m,
        bytes_accessed=out_bytes * n * m + 4 * (n_grid + m_grid))

    # ---- pass 2: tiled Gram kernel over a 2D grid, true (n, m) output ----
    out = pl.pallas_call(
        functools.partial(_gram_kernel, f2_resident=f2_resident),
        out_shape=jax.ShapeDtypeStruct((n, m), out_dtype),
        grid=(gi, gj),
        in_specs=[
            pl.BlockSpec((tm, 1), lambda i, j: (i, 0)),
            f2_spec,
            pl.BlockSpec(memory_space=pltpu.MemorySpace.SMEM),
        ],
        out_specs=pl.BlockSpec((tm, tn), lambda i, j: (i, j)),
        compiler_params=pltpu.CompilerParams(
            dimension_semantics=("parallel", "parallel")),
        cost_estimate=cost,
    )(f1_col, f2_row, gram_scalars)

    return out


# ---------------------------------------------------------------------------
# Pure-JAX reference mirroring the PyTorch forward exactly.
# ---------------------------------------------------------------------------
def deep_kernel_ref(x1, x2, p):
    def rescale(x):
        return (x - p["offset"]) / p["scale"]

    def mlp(x):
        h = jnp.tanh(x * p["w1"] + p["b1"])
        h = jnp.tanh(h @ p["w2"] + p["b2"])
        return jnp.sum(h * p["w3"], axis=-1, keepdims=True) + p["b3"] + x

    x1 = rescale(x1.reshape(-1, 1))
    x2 = rescale(x2.reshape(-1, 1))
    f1 = mlp(x1)
    f2 = mlp(x2)
    mean = f1.mean(0)
    f1, f2 = f1 - mean, f2 - mean
    d = f1[:, None, :] - f2[None, :, :]
    return jnp.exp(-jnp.sum(d * d / p["lens"], axis=-1)) * p["sigma"]


if __name__ == "__main__":
    # layer_description = [1, H, H, 1], nonlinearity = tanh
    n, m, H = 8, 16, 32
    batch_size, dt = 8, 0.1
    # DeepKernel.get_rescale_params(batch_size, dt)
    offset = 0.5 * (batch_size - 1) * dt
    scale = 0.5 * (batch_size - 1) * dt

    key = jax.random.PRNGKey(0)
    ks = jax.random.split(key, 8)

    def uinit(k, shape, fan_in):
        b = 1.0 / np.sqrt(fan_in)
        return jax.random.uniform(k, shape, jnp.float32, minval=-b, maxval=b)

    params = {
        # Linear(1 -> H): stored as (in, out); torch would hold (out, in).
        "w1": uinit(ks[0], (1, H), 1),
        "b1": uinit(ks[1], (1, H), 1),
        # Linear(H -> H)
        "w2": uinit(ks[2], (H, H), H),
        "b2": uinit(ks[3], (1, H), H),
        # Linear(H -> 1): stored as a (1, H) row for lane reduction.
        "w3": uinit(ks[4], (1, H), H),
        "b3": float(uinit(ks[5], (), H)),
        "offset": float(offset),
        "scale": float(scale),
        # rawlens = inverse_softplus(len_init); lens = softplus(rawlens)
        "lens": float(_softplus(_inverse_softplus(0.01))),
        # rawsigma = inverse_softplus(1.0); sigma = softplus(rawsigma)
        "sigma": float(_softplus(_inverse_softplus(1.0))),
    }

    x1 = jax.random.uniform(ks[6], (n,), jnp.float32, minval=0.0, maxval=0.7)
    x2 = jax.random.uniform(ks[7], (m,), jnp.float32, minval=0.0, maxval=0.7)

    out = deep_kernel(x1, x2, params)
    out = jax.block_until_ready(out)

    ref = deep_kernel_ref(x1, x2, params)
    assert out.shape == (n, m)
    np.testing.assert_allclose(np.asarray(out), np.asarray(ref),
                               rtol=2e-3, atol=2e-3)
    print("KERNEL_OK")
</pallas_src>

<mosaic_0001>
module attributes {stable_mosaic.version = 11 : i64} {
  func.func @_mlp_kernel(%arg0: i32, %arg1: memref<8x1xf32, #tpu.memory_space<vmem>>, %arg2: memref<1x128xf32, #tpu.memory_space<vmem>>, %arg3: memref<1x128xf32, #tpu.memory_space<vmem>>, %arg4: memref<128x128xf32, #tpu.memory_space<vmem>>, %arg5: memref<1x128xf32, #tpu.memory_space<vmem>>, %arg6: memref<1x128xf32, #tpu.memory_space<vmem>>, %arg7: memref<3xf32, #tpu.memory_space<smem>>, %arg8: memref<8x1xf32, #tpu.memory_space<vmem>>) attributes {dimension_semantics = [#tpu.dimension_semantics<parallel>], iteration_bounds = array<i64: 1>, scalar_prefetch = 0 : i64, scratch_operands = 0 : i64, tpu.core_type = #tpu.core_type<tc>, window_params = [{transform_indices = @transform_0, window_bounds = array<i64: 8, 1>}, {pipeline_mode = #tpu.pipeline_mode<synchronous>, transform_indices = @transform_1, window_bounds = array<i64: 1, 128>}, {pipeline_mode = #tpu.pipeline_mode<synchronous>, transform_indices = @transform_2, window_bounds = array<i64: 1, 128>}, {pipeline_mode = #tpu.pipeline_mode<synchronous>, transform_indices = @transform_3, window_bounds = array<i64: 128, 128>}, {pipeline_mode = #tpu.pipeline_mode<synchronous>, transform_indices = @transform_4, window_bounds = array<i64: 1, 128>}, {pipeline_mode = #tpu.pipeline_mode<synchronous>, transform_indices = @transform_5, window_bounds = array<i64: 1, 128>}, {transform_indices = @transform_6, window_bounds = array<i64: 3>}, {transform_indices = @transform_7, window_bounds = array<i64: 8, 1>}]} {
    %c0 = arith.constant 0 : index
    %0 = memref.load %arg7[%c0] : memref<3xf32, #tpu.memory_space<smem>>
    %c1 = arith.constant 1 : index
    %1 = memref.load %arg7[%c1] : memref<3xf32, #tpu.memory_space<smem>>
    %c2 = arith.constant 2 : index
    %2 = memref.load %arg7[%c2] : memref<3xf32, #tpu.memory_space<smem>>
    %c0_0 = arith.constant 0 : index
    %c0_1 = arith.constant 0 : index
    %3 = vector.load %arg1[%c0_0, %c0_1] : memref<8x1xf32, #tpu.memory_space<vmem>>, vector<8x1xf32>
    %4 = vector.broadcast %0 : f32 to vector<8x1xf32>
    %5 = arith.mulf %3, %4 : vector<8x1xf32>
    %6 = vector.broadcast %1 : f32 to vector<8x1xf32>
    %7 = arith.addf %5, %6 : vector<8x1xf32>
    %c0_2 = arith.constant 0 : index
    %c0_3 = arith.constant 0 : index
    %8 = vector.load %arg2[%c0_2, %c0_3] : memref<1x128xf32, #tpu.memory_space<vmem>>, vector<1x128xf32>
    %9 = vector.broadcast %7 : vector<8x1xf32> to vector<8x128xf32>
    %10 = vector.broadcast %8 : vector<1x128xf32> to vector<8x128xf32>
    %11 = arith.mulf %9, %10 : vector<8x128xf32>
    %c0_4 = arith.constant 0 : index
    %c0_5 = arith.constant 0 : index
    %12 = vector.load %arg3[%c0_4, %c0_5] : memref<1x128xf32, #tpu.memory_space<vmem>>, vector<1x128xf32>
    %13 = vector.broadcast %12 : vector<1x128xf32> to vector<8x128xf32>
    %14 = arith.addf %11, %13 : vector<8x128xf32>
    %15 = math.tanh %14 : vector<8x128xf32>
    %c0_6 = arith.constant 0 : index
    %c0_7 = arith.constant 0 : index
    %16 = vector.load %arg4[%c0_6, %c0_7] : memref<128x128xf32, #tpu.memory_space<vmem>>, vector<128x128xf32>
    %cst = arith.constant dense<0.000000e+00> : vector<8x128xf32>
    %17 = tpu.matmul %15, %16, %cst {dimension_numbers = #tpu.dot_dimension_numbers<[1], [0], [0], [1], [0, 0, 1, 1], [], []>} : vector<8x128xf32>, vector<128x128xf32>, vector<8x128xf32> -> vector<8x128xf32>
    %c0_8 = arith.constant 0 : index
    %c0_9 = arith.constant 0 : index
    %18 = vector.load %arg5[%c0_8, %c0_9] : memref<1x128xf32, #tpu.memory_space<vmem>>, vector<1x128xf32>
    %19 = vector.broadcast %18 : vector<1x128xf32> to vector<8x128xf32>
    %20 = arith.addf %17, %19 : vector<8x128xf32>
    %21 = math.tanh %20 : vector<8x128xf32>
    %c0_10 = arith.constant 0 : index
    %c0_11 = arith.constant 0 : index
    %22 = vector.load %arg6[%c0_10, %c0_11] : memref<1x128xf32, #tpu.memory_space<vmem>>, vector<1x128xf32>
    %23 = vector.broadcast %22 : vector<1x128xf32> to vector<8x128xf32>
    %24 = arith.mulf %21, %23 : vector<8x128xf32>
    %cst_12 = arith.constant dense<0.000000e+00> : vector<8xf32>
    %25 = vector.multi_reduction <add>, %24, %cst_12 [1] : vector<8x128xf32> to vector<8xf32>
    %26 = vector.shape_cast %25 : vector<8xf32> to vector<8x1xf32>
    %27 = vector.broadcast %2 : f32 to vector<8x1xf32>
    %28 = arith.addf %26, %27 : vector<8x1xf32>
    %29 = arith.addf %28, %7 : vector<8x1xf32>
    %c0_13 = arith.constant 0 : index
    %c0_14 = arith.constant 0 : index
    %30 = vector.load %arg8[%c0_13, %c0_14] : memref<8x1xf32, #tpu.memory_space<vmem>>, vector<8x1xf32>
    tpu.vector_store %arg8[%c0_13, %c0_14], %29 {strides = array<i32>} : memref<8x1xf32, #tpu.memory_space<vmem>>, vector<8x1xf32>,
    return
  }
  func.func @transform_0(%arg0: i32) -> (i32, i32) {
    %c0_i32 = arith.constant 0 : i32
    %c0_i32_0 = arith.constant 0 : i32
    return %arg0, %c0_i32 : i32, i32
  }
  func.func @transform_1(%arg0: i32) -> (i32, i32) {
    %c0_i32 = arith.constant 0 : i32
    %c0_i32_0 = arith.constant 0 : i32
    %c0_i32_1 = arith.constant 0 : i32
    return %c0_i32, %c0_i32_0 : i32, i32
  }
  func.func @transform_2(%arg0: i32) -> (i32, i32) {
    %c0_i32 = arith.constant 0 : i32
    %c0_i32_0 = arith.constant 0 : i32
    %c0_i32_1 = arith.constant 0 : i32
    return %c0_i32, %c0_i32_0 : i32, i32
  }
  func.func @transform_3(%arg0: i32) -> (i32, i32) {
    %c0_i32 = arith.constant 0 : i32
    %c0_i32_0 = arith.constant 0 : i32
    %c0_i32_1 = arith.constant 0 : i32
    return %c0_i32, %c0_i32_0 : i32, i32
  }
  func.func @transform_4(%arg0: i32) -> (i32, i32) {
    %c0_i32 = arith.constant 0 : i32
    %c0_i32_0 = arith.constant 0 : i32
    %c0_i32_1 = arith.constant 0 : i32
    return %c0_i32, %c0_i32_0 : i32, i32
  }
  func.func @transform_5(%arg0: i32) -> (i32, i32) {
    %c0_i32 = arith.constant 0 : i32
    %c0_i32_0 = arith.constant 0 : i32
    %c0_i32_1 = arith.constant 0 : i32
    return %c0_i32, %c0_i32_0 : i32, i32
  }
  func.func @transform_6(%arg0: i32) -> i32 {
    %c0_i32 = arith.constant 0 : i32
    %c0_i32_0 = arith.constant 0 : i32
    return %c0_i32 : i32
  }
  func.func @transform_7(%arg0: i32) -> (i32, i32) {
    %c0_i32 = arith.constant 0 : i32
    %c0_i32_0 = arith.constant 0 : i32
    return %arg0, %c0_i32 : i32, i32
  }
}

</mosaic_0001>

<bundles_post_ra>
// kernel: tpu_custom_call.1
= control target key start
LH: loop header
LB: loop body
LE: loop exit
PB: predicated region body
PF: predicated region fallthrough
CT: control target
= control target key end

     0   :  { %12 = vsyncpa [#allocation3], 0  ;;  %s263_s0 = inlined_call_operand.vmem [shape: f32[8,1], index: 0, kind: input, shape index: {}]   ;;  %s264_s1 = inlined_call_operand.vmem [shape: f32[1,128], index: 1, kind: input, shape index: {}]   ;;  %s265_s2 = inlined_call_operand.vmem [shape: f32[1,128], index: 2, kind: input, shape index: {}]   ;;  %s266_s3 = inlined_call_operand.hbm [shape: f32[128,128], index: 3, kind: input, shape index: {}]   ;;  %s267_s4 = inlined_call_operand.vmem [shape: f32[1,128], index: 4, kind: input, shape index: {}]   ;;  %s268_s5 = inlined_call_operand.vmem [shape: f32[1,128], index: 5, kind: input, shape index: {}]   ;;  %s269_s6 = inlined_call_operand.vmem [shape: f32[3], index: 6, kind: input, shape index: {}]   ;;  %s270_s7 = inlined_call_operand.vmem [shape: f32[8,1], index: 7, kind: output, shape index: {}]  }
   0x1   :  { %s24_s26 = sshll.u32 %s266_s3, 4  ;;  %s25_s26 = int_to_ptr.hbm [resolvable:$true] %s24_s26 }
   0x2   :  { %13 = vsyncpa [#allocation4], 0  ;;  %s194_s27 = smov [#allocation2]   ;;  %s42_s8 = sshll.u32 %s269_s6, 4  ;;  %s43_s8 = int_to_ptr.vmem [resolvable:$true] %s42_s8 }
   0x3   :  { %s26_s28 = sshll.u32 %s194_s27, 4  ;;  %s195_s9 = smov 128   ;;  %s27_s28 = int_to_ptr.vmem [resolvable:$true] %s26_s28 }
   0x4   :  { %s196_s10 = smov 8   ;;  %s197_s11 = smov [#allocation5]  }
   0x5   :  { %32 = dma.hbm_to_vmem [thread:$0]  %s25_s26, 2048, %s27_s28, [#allocation3], %s195_s9, %s195_s9, %s196_s10  }
   0x6   :  { %45 = dma.vmem_to_smem %s43_s8, 16, %s197_s11, [#allocation4]  }
   0x7   :  { %190 = dma.done.wait [#allocation3], 2048  }
   0x8   :  { %191 = vsyncadd [#allocation3], 4294965248 }
   0x9   :  { %192 = dma.done.wait [#allocation4], 16  }
   0xa   :  { %193 = vsyncadd [#allocation4], 4294967280 }
   0xb   :  { %54 = sfence }
   0xc   :  { %s55_s3 = sld [smem:[#allocation5]]  ;;  %v94_v0 = vld [vmem:[#allocation2 + $0x78] sm:$0xff]  ;;  %v93_v1 = vld [vmem:[#allocation2 + $0x70] sm:$0xff]  ;;  %v198_v2 = vmov 0   ;;  %v92_v3 = vld [vmem:[#allocation2 + $0x68] sm:$0xff]  ;;  %vm130_vm0 = vcmask 7168  }
   0xd   :  { %145 = vset.pattern.permute.xlu0 %v198_v2  ;;  %s138_s12 = sld [smem:[#allocation5 + $0x1]]  ;;  %99 = vmatpush.msra.mxu0 %v94_v0  ;;  %v58_v4 = vld [vmem:[%s263_s0] sm:$0xff]  ;;  %v90_v7 = vld [vmem:[#allocation2 + $0x58] sm:$0xff]  ;;  %v89_v10 = vld [vmem:[#allocation2 + $0x50] sm:$0xff] }
   0xe   :  { %v91_v5 = vld [vmem:[#allocation2 + $0x60] sm:$0xff]  ;;  %v88_v12 = vld [vmem:[#allocation2 + $0x48] sm:$0xff]  ;;  %v86_v14 = vld [vmem:[#allocation2 + $0x38] sm:$0xff] }
   0xf   :  { %100 = vmatpush.msra.mxu0 %v93_v1  ;;  %v87_v13 = vld [vmem:[#allocation2 + $0x40] sm:$0xff]  ;;  %v85_v15 = vld [vmem:[#allocation2 + $0x30] sm:$0xff]  ;;  %v84_v16 = vld [vmem:[#allocation2 + $0x28] sm:$0xff] }
  0x10   :  { %v83_v17 = vld [vmem:[#allocation2 + $0x20] sm:$0xff]  ;;  %v82_v18 = vld [vmem:[#allocation2 + $0x18] sm:$0xff]  ;;  %v81_v19 = vld [vmem:[#allocation2 + $0x10] sm:$0xff] }
  0x11   :  { %101 = vmatpush.msra.mxu0 %v92_v3  ;;  %v80_v20 = vld [vmem:[#allocation2 + $0x8] sm:$0xff]  ;;  %v79_v21 = vld [vmem:[#allocation2] sm:$0xff] }
  0x12   :  { %v59_v6 = vstv %s55_s3  ;;  %v146_v22 = vld [vmem:[%s264_s1] ss:$0 sm:$0xff]  ;;  %s139_s1 = sld [smem:[#allocation5 + $0x2]] }
  0x13   :  { %v60_v8 = vmul.f32 %v59_v6, %v58_v4  ;;  %v61_v9 = vstv %s138_s12  ;;  %102 = vmatpush.msra.mxu0 %v91_v5  ;;  %v147_v23 = vld [vmem:[%s265_s2] ss:$0 sm:$0xff] }
  0x14   :  { %v148_v28 = vld [vmem:[%s267_s4] ss:$0 sm:$0xff] }
  0x15   :  { %v62_v11 = vadd.f32 %v61_v9, %v60_v8  ;;  %103 = vmatpush.msra.mxu0 %v90_v7  ;;  %v149_v31 = vld [vmem:[%s268_s5] ss:$0 sm:$0xff] }
  0x17   :  { %66 = vperm.xlu0 %145, %v62_v11   ;;  %104 = vmatpush.msra.mxu0 %v89_v10 }
  0x18   :  { %v127_v34 = vstv %s139_s1 }
  0x19   :  { %105 = vmatpush.msra.mxu0 %v88_v12 }
  0x1b   :  { %106 = vmatpush.msra.mxu0 %v87_v13 }
  0x1d   :  { %107 = vmatpush.msra.mxu0 %v86_v14 }
  0x1f   :  { %108 = vmatpush.msra.mxu0 %v85_v15 }
  0x21   :  { %109 = vmatpush.msra.mxu0 %v84_v16 }
  0x23   :  { %110 = vmatpush.msra.mxu0 %v83_v17 }
  0x25   :  { %111 = vmatpush.msra.mxu0 %v82_v18 }
  0x27   :  { %112 = vmatpush.msra.mxu0 %v81_v19 }
  0x29   :  { %113 = vmatpush.msra.mxu0 %v80_v20 }
  0x2b   :  { %114 = vmatpush.msra.mxu0 %v79_v21 }
  0x89   :  { %v67_v24 = vpop.permute.xlu0 %66 }
  0x8a   :  { %v72_v25 = vmul.f32 %v146_v22, %v67_v24 }
  0x8c   :  { %v77_v26 = vadd.f32 %v147_v23, %v72_v25 }
  0x8e   :  { %150 = vtanh.f32 %v77_v26 }
  0x94   :  { %v151_v27 = vpop.eup %150 }
  0x95   :  { %115 = vmatmul.f32.vlgmr.msra.gmra.mxu0 %v151_v27 }
 0x112   :  { %v116_v29 = vpop.f32.mrf.mxu0 }
 0x113   :  { %v117_v30 = vadd.f32 %v148_v28, %v116_v29 }
 0x115   :  { %152 = vtanh.f32 %v117_v30 }
 0x11b   :  { %v153_v32 = vpop.eup %152 }
 0x11c   :  { %v124_v33 = vmul.f32 %v153_v32, %v149_v31 }
 0x11e   :  { %125 = vadd.xlane.f32.xlu0 %v124_v33 }
 0x191   :  { %v126_v35 = vpop.xlane.xlu0 %125 }
 0x192   :  { %v128_v36 = vadd.f32 %v127_v34, %v126_v35 }
 0x194   :  { %v129_v37 = vadd.f32 %v128_v36, %v62_v11 }
 0x196   :  { %131 = vst.msk [vmem:[%s270_s7] sm:$0xff] %vm130_vm0, %v129_v37 }
 0x197   :  { %136 = vsyncpa [#allocation3], 1 }
 0x198   :  { %137 = vsyncpa [#allocation4], 1 }

</bundles_post_ra>
